<compile_context>
chip_gen: v6e
topology: v6e:2x2x1
jax: 0.10.0
libtpu: 0.0.40
codegen_flags: <defaults>
</compile_context>

<pallas_src>
import jax
import jax.numpy as jnp
from jax.experimental import pallas as pl
from jax.experimental.pallas import tpu as pltpu


# ----------------------------- Pallas kernel -------------------------------

def mlo_fused_kernel(x_ref, w1_ref, b1_ref, w2_ref, b2_ref, o_ref):
    # x_ref:  (bn, 50)  bf16 batch block (streamed)
    # w1_ref: (50, 50)  bf16 fc1 weight, (in, out) layout   (VMEM-resident)
    # b1_ref: (1, 50)   f32
    # w2_ref: (50, 10)  bf16 fc2 weight, (in, out) layout   (VMEM-resident)
    # b2_ref: (1, 10)   f32
    # o_ref:  (bn, 10)  f32 log_softmax output
    x = x_ref[...]
    # fc1 (MXU, bf16 operands, f32 accumulate) + bias + ReLU (VPU, f32)
    h = jnp.dot(x, w1_ref[...], preferred_element_type=jnp.float32) + b1_ref[...]
    h = jnp.maximum(h, 0.0)
    # TODO(synk): training-mode Dropout2d(0.5) (random channel zeroing with
    # 1/(1-p) rescale) omitted; eval/inference identity semantics used.
    # fc2 (MXU, bf16 operands, f32 accumulate) + bias
    z = jnp.dot(h.astype(w2_ref.dtype), w2_ref[...],
                preferred_element_type=jnp.float32) + b2_ref[...]
    # numerically stable log_softmax over the class (lane) axis, all f32
    m = jnp.max(z, axis=-1, keepdims=True)
    zs = z - m
    lse = jnp.log(jnp.sum(jnp.exp(zs), axis=-1, keepdims=True))
    o_ref[...] = (zs - lse).astype(o_ref.dtype)


# ----------------------------- wrapper --------------------------------------

def _round_up(x, m):
    return (x + m - 1) // m * m


def multi_lenet_o_forward(params, x, *, block_n=4096):
    """x: (N, 50) -> (N, 10) float32 log-probabilities."""
    N, D = x.shape
    H = params["w1"].shape[1]            # 50
    O = params["w2"].shape[1]            # 10
    mxu_dtype = params["w1"].dtype       # bf16 (MXU operands only)
    x = x.astype(mxu_dtype)

    # Batch tile: multiple of 8 sublanes, capped at block_n, and split into
    # >= 2 blocks whenever possible so v7x's two TensorCores both get work.
    if N <= 8:
        bn = N                            # full-extent single block
    else:
        bn = max(8, min(block_n, _round_up(pl.cdiv(N, 2), 8)))
    num_blocks = pl.cdiv(N, bn)

    if num_blocks >= 3:
        # Exposed-DMA regime on the sequential single-TC grid: deepen the
        # input pipeline so x DMAs overlap across steps.
        x_spec = pl.BlockSpec((bn, D), lambda i: (i, 0),
                              pipeline_mode=pl.Buffered(3))
    else:
        x_spec = pl.BlockSpec((bn, D), lambda i: (i, 0))

    out = pl.pallas_call(
        mlo_fused_kernel,
        out_shape=jax.ShapeDtypeStruct((N, O), jnp.float32),
        grid=(num_blocks,),
        in_specs=[
            x_spec,                                    # x block (streamed)
            pl.BlockSpec((D, H), lambda i: (0, 0)),    # w1 (resident)
            pl.BlockSpec((1, H), lambda i: (0, 0)),    # b1 (resident)
            pl.BlockSpec((H, O), lambda i: (0, 0)),    # w2 (resident)
            pl.BlockSpec((1, O), lambda i: (0, 0)),    # b2 (resident)
        ],
        out_specs=pl.BlockSpec((bn, O), lambda i: (i, 0)),
        compiler_params=pltpu.CompilerParams(
            dimension_semantics=("parallel",)),        # v7x: shard batch blocks
    )(x, params["w1"], params["b1"], params["w2"], params["b2"])
    return out


# ----------------------------- parameter init --------------------------------

def init_params_f32(key):
    """PyTorch nn.Linear default init; weights stored (in, out) for x @ W."""
    k1, k2, k3, k4 = jax.random.split(key, 4)

    def u(k, shape, fan_in):
        bound = 1.0 / float(fan_in) ** 0.5
        return jax.random.uniform(k, shape, jnp.float32, -bound, bound)

    w1 = u(k1, (50, 50), 50)       # fc1.weight (out, in)
    b1 = u(k2, (50,), 50)
    w2 = u(k3, (10, 50), 50)       # fc2.weight (out, in)
    b2 = u(k4, (10,), 50)
    return {
        "w1": w1.T,                # (50, 50)  (in, out)
        "b1": b1.reshape(1, 50),
        "w2": w2.T,                # (50, 10)  (in, out)
        "b2": b2.reshape(1, 10),
    }


def prepare_params(params_f32):
    """Cast MXU operands to bf16; biases (VPU work) stay f32."""
    return {
        "w1": params_f32["w1"].astype(jnp.bfloat16),
        "b1": params_f32["b1"],
        "w2": params_f32["w2"].astype(jnp.bfloat16),
        "b2": params_f32["b2"],
    }


if __name__ == "__main__":
    key = jax.random.PRNGKey(0)
    pkey, xkey = jax.random.split(key)
    params_f32 = init_params_f32(pkey)
    params = prepare_params(params_f32)
    # The module's forward implies a (N, 50) feature input; batch = 2.
    x = jax.random.normal(xkey, (2, 50), jnp.float32)

    fwd = jax.jit(multi_lenet_o_forward)
    out = fwd(params, x)
    jax.block_until_ready(out)

    assert out.shape == (2, 10) and out.dtype == jnp.float32

    hi = jax.lax.Precision.HIGHEST

    # Precision-matched reference (bf16-rounded MXU operands, f32 math):
    xb = x.astype(jnp.bfloat16).astype(jnp.float32)
    w1 = params["w1"].astype(jnp.float32)
    w2 = params["w2"].astype(jnp.float32)
    h = jnp.maximum(jnp.dot(xb, w1, precision=hi) + params["b1"], 0.0)
    hb = h.astype(jnp.bfloat16).astype(jnp.float32)
    z = jnp.dot(hb, w2, precision=hi) + params["b2"]
    ref = jax.nn.log_softmax(z, axis=1)
    assert jnp.allclose(out, ref, atol=1e-3, rtol=1e-3)

    # Full-f32 module reference (eval mode, dropout = identity): loose check.
    h32 = jnp.maximum(jnp.dot(x, params_f32["w1"], precision=hi)
                      + params_f32["b1"], 0.0)
    z32 = jnp.dot(h32, params_f32["w2"], precision=hi) + params_f32["b2"]
    ref32 = jax.nn.log_softmax(z32, axis=1)
    assert jnp.allclose(out, ref32, atol=5e-2, rtol=5e-2)

    # log-probabilities must exponentiate to a distribution
    assert jnp.allclose(jnp.sum(jnp.exp(out), axis=-1), 1.0, atol=1e-4)

    print("KERNEL_OK")
</pallas_src>

<mosaic_0001>
module attributes {stable_mosaic.version = 11 : i64} {
  func.func @mlo_fused_kernel(%arg0: i32, %arg1: memref<2x50xbf16, #tpu.memory_space<vmem>>, %arg2: memref<50x50xbf16, #tpu.memory_space<vmem>>, %arg3: memref<1x50xf32, #tpu.memory_space<vmem>>, %arg4: memref<50x10xbf16, #tpu.memory_space<vmem>>, %arg5: memref<1x10xf32, #tpu.memory_space<vmem>>, %arg6: memref<2x10xf32, #tpu.memory_space<vmem>>) attributes {dimension_semantics = [#tpu.dimension_semantics<parallel>], iteration_bounds = array<i64: 1>, scalar_prefetch = 0 : i64, scratch_operands = 0 : i64, tpu.core_type = #tpu.core_type<tc>, window_params = [{transform_indices = @transform_0, window_bounds = array<i64: 2, 50>}, {pipeline_mode = #tpu.pipeline_mode<synchronous>, transform_indices = @transform_1, window_bounds = array<i64: 50, 50>}, {pipeline_mode = #tpu.pipeline_mode<synchronous>, transform_indices = @transform_2, window_bounds = array<i64: 1, 50>}, {pipeline_mode = #tpu.pipeline_mode<synchronous>, transform_indices = @transform_3, window_bounds = array<i64: 50, 10>}, {pipeline_mode = #tpu.pipeline_mode<synchronous>, transform_indices = @transform_4, window_bounds = array<i64: 1, 10>}, {transform_indices = @transform_5, window_bounds = array<i64: 2, 10>}]} {
    %c0 = arith.constant 0 : index
    %c0_0 = arith.constant 0 : index
    %0 = vector.load %arg1[%c0, %c0_0] : memref<2x50xbf16, #tpu.memory_space<vmem>>, vector<2x50xbf16>
    %c0_1 = arith.constant 0 : index
    %c0_2 = arith.constant 0 : index
    %1 = vector.load %arg2[%c0_1, %c0_2] : memref<50x50xbf16, #tpu.memory_space<vmem>>, vector<50x50xbf16>
    %cst = arith.constant dense<0.000000e+00> : vector<2x50xf32>
    %2 = tpu.matmul %0, %1, %cst {dimension_numbers = #tpu.dot_dimension_numbers<[1], [0], [0], [1], [0, 0, 1, 1], [], []>} : vector<2x50xbf16>, vector<50x50xbf16>, vector<2x50xf32> -> vector<2x50xf32>
    %c0_3 = arith.constant 0 : index
    %c0_4 = arith.constant 0 : index
    %3 = vector.load %arg3[%c0_3, %c0_4] : memref<1x50xf32, #tpu.memory_space<vmem>>, vector<1x50xf32>
    %4 = vector.broadcast %3 : vector<1x50xf32> to vector<2x50xf32>
    %5 = arith.addf %2, %4 : vector<2x50xf32>
    %cst_5 = arith.constant 0.000000e+00 : f32
    %6 = vector.broadcast %cst_5 : f32 to vector<2x50xf32>
    %7 = arith.maximumf %5, %6 : vector<2x50xf32>
    %8 = arith.truncf %7 : vector<2x50xf32> to vector<2x50xbf16>
    %c0_6 = arith.constant 0 : index
    %c0_7 = arith.constant 0 : index
    %9 = vector.load %arg4[%c0_6, %c0_7] : memref<50x10xbf16, #tpu.memory_space<vmem>>, vector<50x10xbf16>
    %cst_8 = arith.constant dense<0.000000e+00> : vector<2x10xf32>
    %10 = tpu.matmul %8, %9, %cst_8 {dimension_numbers = #tpu.dot_dimension_numbers<[1], [0], [0], [1], [0, 0, 1, 1], [], []>} : vector<2x50xbf16>, vector<50x10xbf16>, vector<2x10xf32> -> vector<2x10xf32>
    %c0_9 = arith.constant 0 : index
    %c0_10 = arith.constant 0 : index
    %11 = vector.load %arg5[%c0_9, %c0_10] : memref<1x10xf32, #tpu.memory_space<vmem>>, vector<1x10xf32>
    %12 = vector.broadcast %11 : vector<1x10xf32> to vector<2x10xf32>
    %13 = arith.addf %10, %12 : vector<2x10xf32>
    %cst_11 = arith.constant dense<0xFF800000> : vector<2xf32>
    %14 = vector.multi_reduction <maximumf>, %13, %cst_11 [1] : vector<2x10xf32> to vector<2xf32>
    %15 = vector.shape_cast %14 : vector<2xf32> to vector<2x1xf32>
    %16 = vector.broadcast %15 : vector<2x1xf32> to vector<2x10xf32>
    %17 = arith.subf %13, %16 : vector<2x10xf32>
    %18 = math.exp %17 : vector<2x10xf32>
    %cst_12 = arith.constant dense<0.000000e+00> : vector<2xf32>
    %19 = vector.multi_reduction <add>, %18, %cst_12 [1] : vector<2x10xf32> to vector<2xf32>
    %20 = vector.shape_cast %19 : vector<2xf32> to vector<2x1xf32>
    %21 = math.log %20 : vector<2x1xf32>
    %22 = vector.broadcast %21 : vector<2x1xf32> to vector<2x10xf32>
    %23 = arith.subf %17, %22 : vector<2x10xf32>
    %c0_13 = arith.constant 0 : index
    %c0_14 = arith.constant 0 : index
    %24 = vector.load %arg6[%c0_13, %c0_14] : memref<2x10xf32, #tpu.memory_space<vmem>>, vector<2x10xf32>
    tpu.vector_store %arg6[%c0_13, %c0_14], %23 {strides = array<i32>} : memref<2x10xf32, #tpu.memory_space<vmem>>, vector<2x10xf32>,
    return
  }
  func.func @transform_0(%arg0: i32) -> (i32, i32) {
    %c0_i32 = arith.constant 0 : i32
    %c0_i32_0 = arith.constant 0 : i32
    return %arg0, %c0_i32 : i32, i32
  }
  func.func @transform_1(%arg0: i32) -> (i32, i32) {
    %c0_i32 = arith.constant 0 : i32
    %c0_i32_0 = arith.constant 0 : i32
    %c0_i32_1 = arith.constant 0 : i32
    return %c0_i32, %c0_i32_0 : i32, i32
  }
  func.func @transform_2(%arg0: i32) -> (i32, i32) {
    %c0_i32 = arith.constant 0 : i32
    %c0_i32_0 = arith.constant 0 : i32
    %c0_i32_1 = arith.constant 0 : i32
    return %c0_i32, %c0_i32_0 : i32, i32
  }
  func.func @transform_3(%arg0: i32) -> (i32, i32) {
    %c0_i32 = arith.constant 0 : i32
    %c0_i32_0 = arith.constant 0 : i32
    %c0_i32_1 = arith.constant 0 : i32
    return %c0_i32, %c0_i32_0 : i32, i32
  }
  func.func @transform_4(%arg0: i32) -> (i32, i32) {
    %c0_i32 = arith.constant 0 : i32
    %c0_i32_0 = arith.constant 0 : i32
    %c0_i32_1 = arith.constant 0 : i32
    return %c0_i32, %c0_i32_0 : i32, i32
  }
  func.func @transform_5(%arg0: i32) -> (i32, i32) {
    %c0_i32 = arith.constant 0 : i32
    %c0_i32_0 = arith.constant 0 : i32
    return %arg0, %c0_i32 : i32, i32
  }
}

</mosaic_0001>

<bundles_post_ra>
// kernel: multi_lenet_o_forward.1
= control target key start
LH: loop header
LB: loop body
LE: loop exit
PB: predicated region body
PF: predicated region fallthrough
CT: control target
= control target key end

     0   :  { %v300_v1 = vmov 0.0   ;;  %vm62_vm0 = vcmask 1040384   ;;  %vm301_vm1 = vmmov 0   ;;  %s372_s0 = inlined_call_operand.vmem [shape: bf16[2,50], index: 0, kind: input, shape index: {}]   ;;  %s373_s1 = inlined_call_operand.vmem [shape: bf16[50,50], index: 1, kind: input, shape index: {}]   ;;  %s374_s2 = inlined_call_operand.vmem [shape: f32[1,50], index: 2, kind: input, shape index: {}]   ;;  %s375_s3 = inlined_call_operand.vmem [shape: bf16[50,10], index: 3, kind: input, shape index: {}]   ;;  %s376_s4 = inlined_call_operand.vmem [shape: f32[1,10], index: 4, kind: input, shape index: {}]   ;;  %s377_s5 = inlined_call_operand.hbm [shape: f32[2,10], index: 5, kind: output, shape index: {}]  }
   0x1   :  { %v266_v0 = vld [vmem:[%s373_s1 + $0x18] ss:$0 sps:$4 sm:$0x11]   ;;  %239 = vmatprep.subr.bf16.mxu0 %v300_v1  ;;  %251 = vmatprep.subr.bf16.mxu1 %v300_v1  ;;  %v267_v3 = vld [vmem:[%s373_s1 + $0x10] sm:$0xff]   ;;  %v268_v5 = vld [vmem:[%s373_s1 + $0x8] sm:$0xff]  }
   0x2   :  { %v64_v2 = vsel %vm62_vm0, %v266_v0, 0  ;;  %247 = vmatprep.mubr.msk.bf16.mxu0 %vm301_vm1, %v300_v1  ;;  %v270_v4 = vld [vmem:[%s375_s3 + $0x18] ss:$0 sps:$4 sm:$0x11]   ;;  %259 = vmatprep.mubr.msk.bf16.mxu1 %vm301_vm1, %v300_v1  ;;  %v271_v7 = vld [vmem:[%s375_s3 + $0x10] sm:$0xff]  }
   0x3   :  { %240 = vmatpush3.bf16.msra.mxu0 %v64_v2  ;;  %v147_v6 = vsel %vm62_vm0, %v270_v4, 0 }
   0x4   :  { %241 = vmatprep.subr.bf16.mxu0 %v300_v1  ;;  %252 = vmatpush3.bf16.msra.mxu1 %v147_v6 }
   0x7   :  { %242 = vmatpush3.bf16.msra.mxu0 %v267_v3 }
   0x8   :  { %243 = vmatprep.subr.bf16.mxu0 %v300_v1 }
   0x9   :  { %10 = vsyncpa [#allocation3], 0  ;;  %253 = vmatprep.subr.bf16.mxu1 %v300_v1  ;;  %v269_v8 = vld [vmem:[%s373_s1] sm:$0xff]   ;;  %vm58_vm2 = vcmask 408576   ;;  %v272_v10 = vld [vmem:[%s375_s3 + $0x8] sm:$0xff]   ;;  %vm189_vm3 = vcmask 74752  }
   0xa   :  { %254 = vmatpush3.bf16.msra.mxu1 %v271_v7  ;;  %v22_v9 = vld [vmem:[%s372_s0] sm:$0x1] }
   0xb   :  { %244 = vmatpush3.bf16.msra.mxu0 %v268_v5  ;;  %255 = vmatprep.subr.bf16.mxu1 %v300_v1  ;;  %v273_v11 = vld [vmem:[%s375_s3] sm:$0xff]  }
   0xc   :  { %245 = vmatprep.subr.bf16.mxu0 %v300_v1  ;;  %v217_v12 = vld [vmem:[%s374_s2] ss:$0 sm:$0xff]  ;;  %s302_s2 = smov [#allocation2]  }
   0xd   :  { %v223_v20 = vld [vmem:[%s376_s4] ss:$0 sm:$0xff]  ;;  %s209_s3 = sshll.u32 %s302_s2, 4  ;;  %s210_s3 = int_to_ptr.vmem [resolvable:$true] %s209_s3 }
   0xe   :  { %256 = vmatpush3.bf16.msra.mxu1 %v272_v10  ;;  %s278_s4 = scalar_lea.vmem %s210_s3, 32  ;;  %p283_p1 = scmp.lt.s32.totalorder %s210_s3, %s210_s3 }
   0xf   :  { %246 = vmatpush3.bf16.msra.mxu0 %v269_v8  ;;  %257 = vmatprep.subr.bf16.mxu1 %v300_v1  ;;  %p279_p0 = scmp.ne.s32.totalorder %s210_s3, %s278_s4  ;;  %p284_p2 = scmp.lt.s32.totalorder %s278_s4, %s278_s4 }
  0x11   :  { %p285_p3 = por %p284_p2, %p283_p1 }
  0x12   :  { %248 = vmatmul.mubr.msk.bf16.vlgmr.msra.gmra.mxu0 %vm58_vm2, %v22_v9  ;;  %258 = vmatpush3.bf16.msra.mxu1 %v273_v11 }
  0x13   :  { %p286_p4 = pnand %p285_p3, %p279_p0 }
  0xd2   :  { %v100_v13 = vpop.f32.mrf.mxu0 }
  0xd3   :  { %v101_v14 = vadd.f32 %v217_v12, %v100_v13 }
  0xd4   :  { %v249_v15 = vpop.f32.mrf.mxu0 }
  0xd5   :  { %v106_v16 = vmax.f32 %v101_v14, 0.0 }
  0xd6   :  { %v103_v17 = vpop.f32.mrf.mxu0 }
  0xd7   :  { %v107_v18 = vpack.c.bf16 %v106_v16, %v106_v16 }
  0xd8   :  { %v250_v19 = vpop.f32.mrf.mxu0 }
  0xd9   :  { %260 = vmatmul.mubr.msk.bf16.vlgmr.msra.gmra.mxu1 %vm58_vm2, %v107_v18 }
 0x199   :  { %v183_v21 = vpop.f32.mrf.mxu1 }
 0x19a   :  { %v184_v22 = vadd.f32 %v223_v20, %v183_v21 }
 0x19b   :  { %v261_v23 = vpop.f32.mrf.mxu1 }
 0x19c   :  { %v190_v24 = vsel %vm189_vm3, %v184_v22, -inf }
 0x19d   :  { %191 = vmax.xlane.f32.xlu0 %v190_v24  ;;  %v186_v25 = vpop.f32.mrf.mxu1 }
 0x19f   :  { %v262_v26 = vpop.f32.mrf.mxu1 }
 0x226   :  { %v192_v27 = vpop.xlane.xlu0 %191 }
 0x227   :  { %v193_v28 = vsub.f32 %v184_v22, %v192_v27 }
 0x229   :  { %v194_v29 = vmul.f32 1.442695, %v193_v28 }
 0x22b   :  { %274 = vpow2.f32 %v194_v29 }
 0x238   :  { %v275_v30 = vpop.eup %274 }
 0x239   :  { %v196_v31 = vsel %vm189_vm3, %v275_v30, 0.0 }
 0x23a   :  { %197 = vadd.xlane.f32.xlu0 %v196_v31 }
 0x2c3   :  { %v198_v32 = vpop.xlane.xlu0 %197 }
 0x2c4   :  { %276 = vlog2.f32 %v198_v32 }
 0x2d1   :  { %v277_v33 = vpop.eup %276 }
 0x2d2   :  { %v200_v34 = vmul.f32 0.6931472, %v277_v33 }
 0x2d4   :  { %v201_v35 = vsub.f32 %v193_v28, %v200_v34 }
 0x2d6   :  { %202 = vst.msk [vmem:[#allocation2] sm:$0x3] %vm189_vm3, %v201_v35 }
 0x2d7   :  { %289 = shalt.err (!%p286_p4)
}
 0x2d8   :  { %212 = dma.vmem_to_hbm [thread:$0]  %s210_s3, 32, %s377_s5, [#allocation3]  }
 0x2d9   :  { %298 = dma.done.wait [#allocation3], 32  }
 0x2da   :  { %299 = vsyncadd [#allocation3], 4294967264 }
 0x2db   :  { %216 = vsyncpa [#allocation3], 1 }

</bundles_post_ra>
